<compile_context>
chip_gen: v5e
topology: v5e:2x2
jax: 0.10.0
libtpu: 0.0.40
codegen_flags: <defaults>
</compile_context>

<pallas_src>
import functools

import jax
import jax.numpy as jnp
from jax import lax
from jax.experimental import pallas as pl
from jax.experimental.pallas import tpu as pltpu


def _coordconv_kernel(x_ref, w_ref, b_ref, o_ref, xpad_ref, *,
                      C, H, W, KH, KW, pad, Cout):
    # x_ref:    (1, C, H*W)           raw input channels, flat spatial (lane-dense)
    # w_ref:    (Cout, KH*KW*(C+2))   conv weight, [tap, channel] flattened on lanes
    # b_ref:    (Cout, 1)             bias
    # o_ref:    (1, Cout, H*W)        output (NCHW, flat spatial, lane-dense stores)
    # xpad_ref: (C+2, H*W + 2*SMAX)   scratch: zero-extended channel rows (implements both
    #                                 the coord-channel concat and the conv zero padding)
    HW = H * W
    Cin = C + 2
    SMAX = pad * (W + 1)          # largest |flat shift| over all taps

    # Flat spatial index -> (row, col). Bit ops when W is a power of two (no integer div).
    idx = lax.broadcasted_iota(jnp.int32, (1, HW), 1)
    if (W & (W - 1)) == 0:
        row = idx >> (W.bit_length() - 1)
        col = idx & (W - 1)
    else:
        # TODO(synk): f32 floor-div fallback; exact for the modest H*W sizes used here.
        row = jnp.floor(idx.astype(jnp.float32) * (1.0 / W)).astype(jnp.int32)
        col = idx - row * W

    # CoordConv channels: torch.linspace(-1, 1, H)[row], torch.linspace(-1, 1, W)[col].
    h_coord = row.astype(jnp.float32) * (2.0 / max(H - 1, 1)) - 1.0
    w_coord = col.astype(jnp.float32) * (2.0 / max(W - 1, 1)) - 1.0

    # Build the zero-extended, channel-stacked input rows in VMEM (zero halo = conv padding).
    xpad_ref[...] = jnp.zeros(xpad_ref.shape, xpad_ref.dtype)
    xpad_ref[pl.ds(0, C), pl.ds(SMAX, HW)] = x_ref[0].astype(jnp.float32)
    xpad_ref[pl.ds(C, 1), pl.ds(SMAX, HW)] = h_coord
    xpad_ref[pl.ds(C + 1, 1), pl.ds(SMAX, HW)] = w_coord

    # Boundary predicates, computed once and reused across taps.
    row_lo = {d: row >= d for d in range(1, pad + 1)}
    row_hi = {d: row < H - d for d in range(1, pad + 1)}
    col_lo = {d: col >= d for d in range(1, pad + 1)}
    col_hi = {d: col < W - d for d in range(1, pad + 1)}

    w_full = w_ref[...]                                   # (Cout, KH*KW*Cin), single load
    acc = jnp.zeros((Cout, HW), jnp.float32)
    for ki in range(KH):
        for kj in range(KW):
            dh, dw = ki - pad, kj - pad
            t = ki * KW + kj
            # Static lane-offset slice == spatially shifted window (row wrap fixed by mask).
            patch = xpad_ref[:, pl.ds(SMAX + dh * W + dw, HW)]        # (Cin, HW)
            conds = []
            if dh < 0:
                conds.append(row_lo[-dh])
            elif dh > 0:
                conds.append(row_hi[dh])
            if dw < 0:
                conds.append(col_lo[-dw])
            elif dw > 0:
                conds.append(col_hi[dw])
            if conds:
                mask = functools.reduce(jnp.logical_and, conds)       # (1, HW)
                patch = jnp.where(mask, patch, 0.0)
            w_tap = w_full[:, t * Cin:(t + 1) * Cin]                  # (Cout, Cin)
            acc = acc + jnp.dot(w_tap, patch, preferred_element_type=jnp.float32)

    acc = acc + b_ref[...]                                # (Cout, 1) broadcast over lanes
    o_ref[0] = acc.astype(o_ref.dtype)


def coord_conv(x_nchw, weight_oikk, bias, *, padding=1, stride=1):
    """Forward pass of CoordConv.

    x_nchw:      (B, C, H, W)        float32
    weight_oikk: (Cout, C+2, KH, KW) float32 (PyTorch Conv2d layout)
    bias:        (Cout,)             float32
    returns:     (B, Cout, H, W)     float32 (NCHW, like the PyTorch module)
    """
    B, C, H, W = x_nchw.shape
    Cout, Cin, KH, KW = weight_oikk.shape
    assert Cin == C + 2
    assert stride == 1, "kernel implements stride=1 (module default)"
    # TODO(synk): only the 'same' configuration (K = 2*padding + 1, stride=1) is implemented;
    # this matches the module's kernel_size=3, padding=1 usage.
    assert KH == KW == 2 * padding + 1, "kernel implements 'same' convs only"

    HW = H * W
    SMAX = padding * (W + 1)

    # Wrapper does only free reshapes (no concat / transpose / pad HBM passes).
    x2d = x_nchw.reshape(B, C, HW)
    w2d = jnp.transpose(weight_oikk, (0, 2, 3, 1)).reshape(Cout, KH * KW * Cin)
    b2d = bias.reshape(Cout, 1)

    kernel = functools.partial(_coordconv_kernel, C=C, H=H, W=W, KH=KH, KW=KW,
                               pad=padding, Cout=Cout)

    out2d = pl.pallas_call(
        kernel,
        out_shape=jax.ShapeDtypeStruct((B, Cout, HW), x_nchw.dtype),
        grid_spec=pltpu.PrefetchScalarGridSpec(
            num_scalar_prefetch=0,
            grid=(B,),
            in_specs=[
                pl.BlockSpec((1, C, HW), lambda b: (b, 0, 0)),
                pl.BlockSpec((Cout, KH * KW * Cin), lambda b: (0, 0)),
                pl.BlockSpec((Cout, 1), lambda b: (0, 0)),
            ],
            out_specs=pl.BlockSpec((1, Cout, HW), lambda b: (b, 0, 0)),
            scratch_shapes=[pltpu.VMEM((Cin, HW + 2 * SMAX), jnp.float32)],
        ),
        compiler_params=pltpu.CompilerParams(
            dimension_semantics=("parallel",),
        ),
    )(x2d, w2d, b2d)

    return out2d.reshape(B, Cout, H, W)


def _reference(x_nchw, weight_oikk, bias, padding=1, stride=1):
    B, C, H, W = x_nchw.shape
    h_pad = jnp.linspace(-1.0, 1.0, H, dtype=x_nchw.dtype).reshape(1, 1, H, 1)
    h_pad = jnp.broadcast_to(h_pad, (B, 1, H, W))
    w_pad = jnp.linspace(-1.0, 1.0, W, dtype=x_nchw.dtype).reshape(1, 1, 1, W)
    w_pad = jnp.broadcast_to(w_pad, (B, 1, H, W))
    x_cat = jnp.concatenate((x_nchw, h_pad, w_pad), axis=1)
    out = jax.lax.conv_general_dilated(
        x_cat, weight_oikk,
        window_strides=(stride, stride),
        padding=((padding, padding), (padding, padding)),
        dimension_numbers=("NCHW", "OIHW", "NCHW"),
    )
    return out + bias.reshape(1, -1, 1, 1)


if __name__ == "__main__":
    # Small shapes consistent with the module: in_dim=4, out_dim=8, kernel_size=3
    B, C, H, W = 2, 4, 16, 16
    OUT_DIM, K = 8, 3

    key = jax.random.PRNGKey(0)
    kx, kw, kb = jax.random.split(key, 3)
    x = jax.random.normal(kx, (B, C, H, W), dtype=jnp.float32)
    # Deterministic Conv2d parameter init (PyTorch layout: (out, in+2, kh, kw))
    fan_in = (C + 2) * K * K
    bound = 1.0 / jnp.sqrt(fan_in)
    weight = jax.random.uniform(kw, (OUT_DIM, C + 2, K, K),
                                minval=-bound, maxval=bound, dtype=jnp.float32)
    bias = jax.random.uniform(kb, (OUT_DIM,), minval=-bound, maxval=bound,
                              dtype=jnp.float32)

    out = coord_conv(x, weight, bias, padding=1, stride=1)
    out = jax.block_until_ready(out)

    ref = jax.block_until_ready(_reference(x, weight, bias, padding=1, stride=1))
    assert out.shape == (B, OUT_DIM, H, W), out.shape
    assert jnp.allclose(out, ref, atol=1e-4, rtol=1e-4), \
        float(jnp.max(jnp.abs(out - ref)))

    print("KERNEL_OK")
</pallas_src>

<mosaic_0001>
module attributes {stable_mosaic.version = 11 : i64} {
  func.func @_coordconv_kernel(%arg0: i32, %arg1: memref<1x4x256xf32, #tpu.memory_space<vmem>>, %arg2: memref<8x54xf32, #tpu.memory_space<vmem>>, %arg3: memref<8x1xf32, #tpu.memory_space<vmem>>, %arg4: memref<1x8x256xf32, #tpu.memory_space<vmem>>, %arg5: memref<6x290xf32, #tpu.memory_space<vmem>>) attributes {dimension_semantics = [#tpu.dimension_semantics<parallel>], iteration_bounds = array<i64: 2>, scalar_prefetch = 0 : i64, scratch_operands = 1 : i64, tpu.core_type = #tpu.core_type<tc>, window_params = [{transform_indices = @transform_0, window_bounds = array<i64: 1, 4, 256>}, {pipeline_mode = #tpu.pipeline_mode<synchronous>, transform_indices = @transform_1, window_bounds = array<i64: 8, 54>}, {pipeline_mode = #tpu.pipeline_mode<synchronous>, transform_indices = @transform_2, window_bounds = array<i64: 8, 1>}, {transform_indices = @transform_3, window_bounds = array<i64: 1, 8, 256>}]} {
    %0 = tpu.iota {dimensions = array<i32: 1>} : vector<1x256xi32>
    %c4_i32 = arith.constant 4 : i32
    %1 = vector.broadcast %c4_i32 : i32 to vector<1x256xi32>
    %2 = arith.shrsi %0, %1 : vector<1x256xi32>
    %c15_i32 = arith.constant 15 : i32
    %3 = vector.broadcast %c15_i32 : i32 to vector<1x256xi32>
    %4 = arith.andi %0, %3 : vector<1x256xi32>
    %5 = arith.sitofp %2 : vector<1x256xi32> to vector<1x256xf32>
    %cst = arith.constant 0.13333334 : f32
    %6 = vector.broadcast %cst : f32 to vector<1x256xf32>
    %7 = arith.mulf %5, %6 : vector<1x256xf32>
    %cst_0 = arith.constant 1.000000e+00 : f32
    %8 = vector.broadcast %cst_0 : f32 to vector<1x256xf32>
    %9 = arith.subf %7, %8 : vector<1x256xf32>
    %10 = arith.sitofp %4 : vector<1x256xi32> to vector<1x256xf32>
    %cst_1 = arith.constant 0.13333334 : f32
    %11 = vector.broadcast %cst_1 : f32 to vector<1x256xf32>
    %12 = arith.mulf %10, %11 : vector<1x256xf32>
    %cst_2 = arith.constant 1.000000e+00 : f32
    %13 = vector.broadcast %cst_2 : f32 to vector<1x256xf32>
    %14 = arith.subf %12, %13 : vector<1x256xf32>
    %cst_3 = arith.constant 0.000000e+00 : f32
    %15 = vector.broadcast %cst_3 : f32 to vector<6x290xf32>
    %c0 = arith.constant 0 : index
    %c0_4 = arith.constant 0 : index
    %16 = vector.load %arg5[%c0, %c0_4] : memref<6x290xf32, #tpu.memory_space<vmem>>, vector<6x290xf32>
    tpu.vector_store %arg5[%c0, %c0_4], %15 {strides = array<i32>} : memref<6x290xf32, #tpu.memory_space<vmem>>, vector<6x290xf32>,
    %c0_5 = arith.constant 0 : index
    %c0_6 = arith.constant 0 : index
    %c0_7 = arith.constant 0 : index
    %17 = vector.load %arg1[%c0_5, %c0_6, %c0_7] : memref<1x4x256xf32, #tpu.memory_space<vmem>>, vector<1x4x256xf32>
    %18 = vector.shape_cast %17 : vector<1x4x256xf32> to vector<4x256xf32>
    %c0_8 = arith.constant 0 : index
    %c17 = arith.constant 17 : index
    %19 = vector.load %arg5[%c0_8, %c17] : memref<6x290xf32, #tpu.memory_space<vmem>>, vector<4x256xf32>
    tpu.vector_store %arg5[%c0_8, %c17], %18 {strides = array<i32>} : memref<6x290xf32, #tpu.memory_space<vmem>>, vector<4x256xf32>,
    %c4 = arith.constant 4 : index
    %c17_9 = arith.constant 17 : index
    %20 = vector.load %arg5[%c4, %c17_9] : memref<6x290xf32, #tpu.memory_space<vmem>>, vector<1x256xf32>
    tpu.vector_store %arg5[%c4, %c17_9], %9 {strides = array<i32>} : memref<6x290xf32, #tpu.memory_space<vmem>>, vector<1x256xf32>,
    %c5 = arith.constant 5 : index
    %c17_10 = arith.constant 17 : index
    %21 = vector.load %arg5[%c5, %c17_10] : memref<6x290xf32, #tpu.memory_space<vmem>>, vector<1x256xf32>
    tpu.vector_store %arg5[%c5, %c17_10], %14 {strides = array<i32>} : memref<6x290xf32, #tpu.memory_space<vmem>>, vector<1x256xf32>,
    %c1_i32 = arith.constant 1 : i32
    %22 = vector.broadcast %c1_i32 : i32 to vector<1x256xi32>
    %23 = arith.cmpi sge, %2, %22 : vector<1x256xi32>
    %c15_i32_11 = arith.constant 15 : i32
    %24 = vector.broadcast %c15_i32_11 : i32 to vector<1x256xi32>
    %25 = arith.cmpi slt, %2, %24 : vector<1x256xi32>
    %c1_i32_12 = arith.constant 1 : i32
    %26 = vector.broadcast %c1_i32_12 : i32 to vector<1x256xi32>
    %27 = arith.cmpi sge, %4, %26 : vector<1x256xi32>
    %c15_i32_13 = arith.constant 15 : i32
    %28 = vector.broadcast %c15_i32_13 : i32 to vector<1x256xi32>
    %29 = arith.cmpi slt, %4, %28 : vector<1x256xi32>
    %c0_14 = arith.constant 0 : index
    %c0_15 = arith.constant 0 : index
    %30 = vector.load %arg2[%c0_14, %c0_15] : memref<8x54xf32, #tpu.memory_space<vmem>>, vector<8x54xf32>
    %cst_16 = arith.constant 0.000000e+00 : f32
    %31 = vector.broadcast %cst_16 : f32 to vector<8x256xf32>
    %c0_17 = arith.constant 0 : index
    %c0_18 = arith.constant 0 : index
    %32 = vector.load %arg5[%c0_17, %c0_18] : memref<6x290xf32, #tpu.memory_space<vmem>>, vector<6x256xf32>
    %33 = arith.andi %23, %27 : vector<1x256xi1>
    %cst_19 = arith.constant 0.000000e+00 : f32
    %34 = vector.shape_cast %33 : vector<1x256xi1> to vector<1x256xi1>
    %35 = vector.broadcast %34 : vector<1x256xi1> to vector<6x256xi1>
    %36 = vector.broadcast %cst_19 : f32 to vector<6x256xf32>
    %37 = arith.select %35, %32, %36 : vector<6x256xi1>, vector<6x256xf32>
    %38 = vector.extract_strided_slice %30 {offsets = [0, 0], sizes = [8, 6], strides = [1, 1]} : vector<8x54xf32> to vector<8x6xf32>
    %cst_20 = arith.constant dense<0.000000e+00> : vector<8x256xf32>
    %39 = tpu.matmul %38, %37, %cst_20 {dimension_numbers = #tpu.dot_dimension_numbers<[1], [0], [0], [1], [0, 0, 1, 1], [], []>} : vector<8x6xf32>, vector<6x256xf32>, vector<8x256xf32> -> vector<8x256xf32>
    %40 = arith.addf %31, %39 : vector<8x256xf32>
    %c0_21 = arith.constant 0 : index
    %c1 = arith.constant 1 : index
    %41 = vector.load %arg5[%c0_21, %c1] : memref<6x290xf32, #tpu.memory_space<vmem>>, vector<6x256xf32>
    %cst_22 = arith.constant 0.000000e+00 : f32
    %42 = vector.shape_cast %23 : vector<1x256xi1> to vector<1x256xi1>
    %43 = vector.broadcast %42 : vector<1x256xi1> to vector<6x256xi1>
    %44 = vector.broadcast %cst_22 : f32 to vector<6x256xf32>
    %45 = arith.select %43, %41, %44 : vector<6x256xi1>, vector<6x256xf32>
    %46 = vector.extract_strided_slice %30 {offsets = [0, 6], sizes = [8, 6], strides = [1, 1]} : vector<8x54xf32> to vector<8x6xf32>
    %cst_23 = arith.constant dense<0.000000e+00> : vector<8x256xf32>
    %47 = tpu.matmul %46, %45, %cst_23 {dimension_numbers = #tpu.dot_dimension_numbers<[1], [0], [0], [1], [0, 0, 1, 1], [], []>} : vector<8x6xf32>, vector<6x256xf32>, vector<8x256xf32> -> vector<8x256xf32>
    %48 = arith.addf %40, %47 : vector<8x256xf32>
    %c0_24 = arith.constant 0 : index
    %c2 = arith.constant 2 : index
    %49 = vector.load %arg5[%c0_24, %c2] : memref<6x290xf32, #tpu.memory_space<vmem>>, vector<6x256xf32>
    %50 = arith.andi %23, %29 : vector<1x256xi1>
    %cst_25 = arith.constant 0.000000e+00 : f32
    %51 = vector.shape_cast %50 : vector<1x256xi1> to vector<1x256xi1>
    %52 = vector.broadcast %51 : vector<1x256xi1> to vector<6x256xi1>
    %53 = vector.broadcast %cst_25 : f32 to vector<6x256xf32>
    %54 = arith.select %52, %49, %53 : vector<6x256xi1>, vector<6x256xf32>
    %55 = vector.extract_strided_slice %30 {offsets = [0, 12], sizes = [8, 6], strides = [1, 1]} : vector<8x54xf32> to vector<8x6xf32>
    %cst_26 = arith.constant dense<0.000000e+00> : vector<8x256xf32>
    %56 = tpu.matmul %55, %54, %cst_26 {dimension_numbers = #tpu.dot_dimension_numbers<[1], [0], [0], [1], [0, 0, 1, 1], [], []>} : vector<8x6xf32>, vector<6x256xf32>, vector<8x256xf32> -> vector<8x256xf32>
    %57 = arith.addf %48, %56 : vector<8x256xf32>
    %c0_27 = arith.constant 0 : index
    %c16 = arith.constant 16 : index
    %58 = vector.load %arg5[%c0_27, %c16] : memref<6x290xf32, #tpu.memory_space<vmem>>, vector<6x256xf32>
    %cst_28 = arith.constant 0.000000e+00 : f32
    %59 = vector.shape_cast %27 : vector<1x256xi1> to vector<1x256xi1>
    %60 = vector.broadcast %59 : vector<1x256xi1> to vector<6x256xi1>
    %61 = vector.broadcast %cst_28 : f32 to vector<6x256xf32>
    %62 = arith.select %60, %58, %61 : vector<6x256xi1>, vector<6x256xf32>
    %63 = vector.extract_strided_slice %30 {offsets = [0, 18], sizes = [8, 6], strides = [1, 1]} : vector<8x54xf32> to vector<8x6xf32>
    %cst_29 = arith.constant dense<0.000000e+00> : vector<8x256xf32>
    %64 = tpu.matmul %63, %62, %cst_29 {dimension_numbers = #tpu.dot_dimension_numbers<[1], [0], [0], [1], [0, 0, 1, 1], [], []>} : vector<8x6xf32>, vector<6x256xf32>, vector<8x256xf32> -> vector<8x256xf32>
    %65 = arith.addf %57, %64 : vector<8x256xf32>
    %c0_30 = arith.constant 0 : index
    %c17_31 = arith.constant 17 : index
    %66 = vector.load %arg5[%c0_30, %c17_31] : memref<6x290xf32, #tpu.memory_space<vmem>>, vector<6x256xf32>
    %67 = vector.extract_strided_slice %30 {offsets = [0, 24], sizes = [8, 6], strides = [1, 1]} : vector<8x54xf32> to vector<8x6xf32>
    %cst_32 = arith.constant dense<0.000000e+00> : vector<8x256xf32>
    %68 = tpu.matmul %67, %66, %cst_32 {dimension_numbers = #tpu.dot_dimension_numbers<[1], [0], [0], [1], [0, 0, 1, 1], [], []>} : vector<8x6xf32>, vector<6x256xf32>, vector<8x256xf32> -> vector<8x256xf32>
    %69 = arith.addf %65, %68 : vector<8x256xf32>
    %c0_33 = arith.constant 0 : index
    %c18 = arith.constant 18 : index
    %70 = vector.load %arg5[%c0_33, %c18] : memref<6x290xf32, #tpu.memory_space<vmem>>, vector<6x256xf32>
    %cst_34 = arith.constant 0.000000e+00 : f32
    %71 = vector.shape_cast %29 : vector<1x256xi1> to vector<1x256xi1>
    %72 = vector.broadcast %71 : vector<1x256xi1> to vector<6x256xi1>
    %73 = vector.broadcast %cst_34 : f32 to vector<6x256xf32>
    %74 = arith.select %72, %70, %73 : vector<6x256xi1>, vector<6x256xf32>
    %75 = vector.extract_strided_slice %30 {offsets = [0, 30], sizes = [8, 6], strides = [1, 1]} : vector<8x54xf32> to vector<8x6xf32>
    %cst_35 = arith.constant dense<0.000000e+00> : vector<8x256xf32>
    %76 = tpu.matmul %75, %74, %cst_35 {dimension_numbers = #tpu.dot_dimension_numbers<[1], [0], [0], [1], [0, 0, 1, 1], [], []>} : vector<8x6xf32>, vector<6x256xf32>, vector<8x256xf32> -> vector<8x256xf32>
    %77 = arith.addf %69, %76 : vector<8x256xf32>
    %c0_36 = arith.constant 0 : index
    %c32 = arith.constant 32 : index
    %78 = vector.load %arg5[%c0_36, %c32] : memref<6x290xf32, #tpu.memory_space<vmem>>, vector<6x256xf32>
    %79 = arith.andi %25, %27 : vector<1x256xi1>
    %cst_37 = arith.constant 0.000000e+00 : f32
    %80 = vector.shape_cast %79 : vector<1x256xi1> to vector<1x256xi1>
    %81 = vector.broadcast %80 : vector<1x256xi1> to vector<6x256xi1>
    %82 = vector.broadcast %cst_37 : f32 to vector<6x256xf32>
    %83 = arith.select %81, %78, %82 : vector<6x256xi1>, vector<6x256xf32>
    %84 = vector.extract_strided_slice %30 {offsets = [0, 36], sizes = [8, 6], strides = [1, 1]} : vector<8x54xf32> to vector<8x6xf32>
    %cst_38 = arith.constant dense<0.000000e+00> : vector<8x256xf32>
    %85 = tpu.matmul %84, %83, %cst_38 {dimension_numbers = #tpu.dot_dimension_numbers<[1], [0], [0], [1], [0, 0, 1, 1], [], []>} : vector<8x6xf32>, vector<6x256xf32>, vector<8x256xf32> -> vector<8x256xf32>
    %86 = arith.addf %77, %85 : vector<8x256xf32>
    %c0_39 = arith.constant 0 : index
    %c33 = arith.constant 33 : index
    %87 = vector.load %arg5[%c0_39, %c33] : memref<6x290xf32, #tpu.memory_space<vmem>>, vector<6x256xf32>
    %cst_40 = arith.constant 0.000000e+00 : f32
    %88 = vector.shape_cast %25 : vector<1x256xi1> to vector<1x256xi1>
    %89 = vector.broadcast %88 : vector<1x256xi1> to vector<6x256xi1>
    %90 = vector.broadcast %cst_40 : f32 to vector<6x256xf32>
    %91 = arith.select %89, %87, %90 : vector<6x256xi1>, vector<6x256xf32>
    %92 = vector.extract_strided_slice %30 {offsets = [0, 42], sizes = [8, 6], strides = [1, 1]} : vector<8x54xf32> to vector<8x6xf32>
    %cst_41 = arith.constant dense<0.000000e+00> : vector<8x256xf32>
    %93 = tpu.matmul %92, %91, %cst_41 {dimension_numbers = #tpu.dot_dimension_numbers<[1], [0], [0], [1], [0, 0, 1, 1], [], []>} : vector<8x6xf32>, vector<6x256xf32>, vector<8x256xf32> -> vector<8x256xf32>
    %94 = arith.addf %86, %93 : vector<8x256xf32>
    %c0_42 = arith.constant 0 : index
    %c34 = arith.constant 34 : index
    %95 = vector.load %arg5[%c0_42, %c34] : memref<6x290xf32, #tpu.memory_space<vmem>>, vector<6x256xf32>
    %96 = arith.andi %25, %29 : vector<1x256xi1>
    %cst_43 = arith.constant 0.000000e+00 : f32
    %97 = vector.shape_cast %96 : vector<1x256xi1> to vector<1x256xi1>
    %98 = vector.broadcast %97 : vector<1x256xi1> to vector<6x256xi1>
    %99 = vector.broadcast %cst_43 : f32 to vector<6x256xf32>
    %100 = arith.select %98, %95, %99 : vector<6x256xi1>, vector<6x256xf32>
    %101 = vector.extract_strided_slice %30 {offsets = [0, 48], sizes = [8, 6], strides = [1, 1]} : vector<8x54xf32> to vector<8x6xf32>
    %cst_44 = arith.constant dense<0.000000e+00> : vector<8x256xf32>
    %102 = tpu.matmul %101, %100, %cst_44 {dimension_numbers = #tpu.dot_dimension_numbers<[1], [0], [0], [1], [0, 0, 1, 1], [], []>} : vector<8x6xf32>, vector<6x256xf32>, vector<8x256xf32> -> vector<8x256xf32>
    %103 = arith.addf %94, %102 : vector<8x256xf32>
    %c0_45 = arith.constant 0 : index
    %c0_46 = arith.constant 0 : index
    %104 = vector.load %arg3[%c0_45, %c0_46] : memref<8x1xf32, #tpu.memory_space<vmem>>, vector<8x1xf32>
    %105 = vector.broadcast %104 : vector<8x1xf32> to vector<8x256xf32>
    %106 = arith.addf %103, %105 : vector<8x256xf32>
    %c0_47 = arith.constant 0 : index
    %c0_48 = arith.constant 0 : index
    %c0_49 = arith.constant 0 : index
    %107 = vector.load %arg4[%c0_47, %c0_48, %c0_49] : memref<1x8x256xf32, #tpu.memory_space<vmem>>, vector<1x8x256xf32>
    %108 = vector.shape_cast %107 : vector<1x8x256xf32> to vector<8x256xf32>
    %109 = vector.shape_cast %106 : vector<8x256xf32> to vector<1x8x256xf32>
    tpu.vector_store %arg4[%c0_47, %c0_48, %c0_49], %109 {strides = array<i32>} : memref<1x8x256xf32, #tpu.memory_space<vmem>>, vector<1x8x256xf32>,
    return
  }
  func.func @transform_0(%arg0: i32) -> (i32, i32, i32) {
    %c0_i32 = arith.constant 0 : i32
    %c0_i32_0 = arith.constant 0 : i32
    %c0_i32_1 = arith.constant 0 : i32
    return %arg0, %c0_i32, %c0_i32_0 : i32, i32, i32
  }
  func.func @transform_1(%arg0: i32) -> (i32, i32) {
    %c0_i32 = arith.constant 0 : i32
    %c0_i32_0 = arith.constant 0 : i32
    %c0_i32_1 = arith.constant 0 : i32
    return %c0_i32, %c0_i32_0 : i32, i32
  }
  func.func @transform_2(%arg0: i32) -> (i32, i32) {
    %c0_i32 = arith.constant 0 : i32
    %c0_i32_0 = arith.constant 0 : i32
    %c0_i32_1 = arith.constant 0 : i32
    return %c0_i32, %c0_i32_0 : i32, i32
  }
  func.func @transform_3(%arg0: i32) -> (i32, i32, i32) {
    %c0_i32 = arith.constant 0 : i32
    %c0_i32_0 = arith.constant 0 : i32
    %c0_i32_1 = arith.constant 0 : i32
    return %arg0, %c0_i32, %c0_i32_0 : i32, i32, i32
  }
}

</mosaic_0001>

<bundles_post_ra>
// kernel: tpu_custom_call.1
= control target key start
LH: loop header
LB: loop body
LE: loop exit
PB: predicated region body
PF: predicated region fallthrough
CT: control target
= control target key end

     0   :  { %8 = vsyncpa [#allocation4], 0  ;;  %s1524_s0 = inlined_call_operand.hbm [shape: f32[2,4,256], index: 0, kind: input, shape index: {}]   ;;  %s1525_s1 = inlined_call_operand.vmem [shape: f32[8,54], index: 1, kind: input, shape index: {}]   ;;  %s1526_s2 = inlined_call_operand.vmem [shape: f32[8,1], index: 2, kind: input, shape index: {}]   ;;  %s1527_s3 = inlined_call_operand.hbm [shape: f32[2,8,256], index: 3, kind: output, shape index: {}]  }
   0x1   :  { %10 = vsyncpa [#allocation4 + $0x1], 0 }
   0x2   :  { %11 = vsyncpa [#allocation5], 0 }
   0x3   :  { %13 = vsyncpa [#allocation5 + $0x1], 0  ;;  %s1234_s12 = smov 0   ;;  %s1236_s13 = smov 0  }
   0x4   :  { %s1238_s14 = smov 0   ;;  %s1240_s15 = smov 0  }
   0x5 LB: > { %s1255_s16 = sadd.s32 4294967295, %s1194_s15   ;;  %s977_s17 = sadd.s32 4294967294, %s1194_s15   ;;  %s1194_s15 = sphi %s1240_s15, %s1541_s15   ;;  %s1190_s14 = sphi %s1238_s14, %s1540_s14   ;;  %s1186_s13 = sphi %s1236_s13, %s1539_s13   ;;  %s1182_s12 = sphi %s1234_s12, %s1538_s12  }
   0x6   : > { %s1259_s18 = sadd.s32 1, %s1194_s15   ;;  %s26_s19 = sadd.s32 1, %s1190_s14 }
   0x7   : > { %s23_s20 = ssub.s32 %s1194_s15, %s1259_s18  ;;  %p33_p0 = scmp.ne.s32.totalorder %s1190_s14, %s1186_s13 }
   0x8   : > { %p24_p1 = scmp.eq.s32.totalorder %s23_s20, 0  ;;  %p34_p2 = scmp.eq.s32.totalorder %s1194_s15, 0 }
   0x9   : > { %p39_p3 = scmp.ne.s32.totalorder %s1186_s13, %s1182_s12  ;;  %p40_p4 = scmp.eq.s32.totalorder %s1255_s16, 0 }
   0xa   : > { %s1271_s21 = scalar_select %p24_p1, %s1190_s14, %s26_s19  }
   0xb   : > { %p1273_p5 = por %p34_p2, %p33_p0  ;;  %p1277_p6 = por %p40_p4, %p39_p3 }
   0xc   : > { %p105_p7 = scmp.eq.s32.totalorder %s1255_s16, 1  ;;  %p111_p8 = scmp.eq.s32.totalorder %s977_s17, 1 }
   0xd   : > { %p1045_p10 = scmp.lt.s32.totalorder %s1194_s15, 2  ;;  %s137_s26 = sand.u32 1, %s1190_s14  }
   0xe   : > { %p1284_p11 = por %p105_p7, %p33_p0  ;;  %p1288_p12 = por %p111_p8, %p39_p3 }
   0xf   : > { %s1031_s27 = sshll.u32 %s1194_s15, 3  ;;  %s980_s28 = sshll.u32 %s137_s26, 3 }
  0x10   : > { %s146_s4 = scalar_lea.hbm %s1524_s0, %s1031_s27  ;;  %s141_s6 = scalar_lea.vmem [#allocation3], %s980_s28 }
  0x11   : > { %s148_s5 = sshll.u32 %s146_s4, 4  ;;  %s150_s7 = sshll.u32 %s141_s6, 4  ;;  %s149_s5 = int_to_ptr.hbm [resolvable:$true] %s148_s5  ;;  %s151_s7 = int_to_ptr.vmem [resolvable:$true] %s150_s7 }
  0x12   : > { %p1299_p13 = pnand %p1045_p10, %p1273_p5  ;;  %p983_p0 = scmp.ge.s32.totalorder %s1194_s15, 1 }
  0x13   : > { %p155_p1 = scmp.lt.s32.totalorder %s1194_s15, 3  ;;  %s138_s9 = scalar_lea.sflag [#allocation4], %s137_s26 }
  0x14   : > { %s1098_s10 = sshra.s32 %s149_s5, 4  ;;  %p1102_p3 = pneg %p1299_p13  ;;  %s1099_s10 = int_to_ptr.hbm [resolvable:$true] %s1098_s10 }
  0x15   : > { %s1100_s11 = scalar_lea.hbm %s1099_s10, 8  ;;  %s1105_s20 = scalar_lea.hbm %s1524_s0, 16 }
  0x16   : > { %p1101_p2 = scmp.ne.s32.totalorder %s1099_s10, %s1100_s11  ;;  %p1106_p5 = scmp.lt.s32.totalorder %s1099_s10, %s1524_s0 }
  0x17   : > { %p1107_p8 = scmp.lt.s32.totalorder %s1105_s20, %s1100_s11 }
  0x18   : > { %p1103_p4 = pnand %p1102_p3, %p1101_p2 }
  0x19   : > { %p1108_p10 = por %p1107_p8, %p1106_p5 }
  0x1a   : > { %p1104_p7 = pneg %p1103_p4 }
  0x1c   : > { %p1109_p9 = pnand %p1108_p10, %p1104_p7 }
  0x1e   : > { %1112 = shalt.err (!%p1109_p9)
}
  0x1f   : > { %1040 = dma.hbm_to_vmem [thread:$0]  (!%p1299_p13), %s149_s5, 128, %s151_s7, %s138_s9  }
  0x20   : > { %p156_p2 = pnand %p983_p0, %p155_p1 }
  0x21   : > { %s1320_s26 = sand.u32 (!%p156_p2), 1, %s1186_s13  }
  0x22   : > { %159 = sbr.rel (%p156_p2) target bundleno = 499 (0x1f3), region = 32  ;;  %s984_s28 = sshll.u32 (!%p156_p2), %s1320_s26, 3 }
  0x23   : > { %s162_s29 = scalar_lea.sflag (!%p156_p2), [#allocation4], %s1320_s26  ;;  %s165_s30 = scalar_lea.vmem (!%p156_p2), [#allocation3], %s984_s28 }
  0x27   : > { %1173 = dma.done.wait (%p1277_p6), %s162_s29, 128  }
  0x28   : > { %1175 = vsyncadd (%p1277_p6), %s162_s29, 4294967168  ;;  %v189_v0 = vlaneseq  ;;  %v1196_v1 = vmov 0.0   ;;  %v212_v9 = vld [vmem:[%s165_s30] sm:$0xff]  ;;  %s1197_s5 = smov 116   ;;  %vm234_vm0 = vcmask 1040384   ;;  %s1198_s6 = smov 17  }
  0x29   : > { %208 = vst [vmem:[#allocation2] sm:$0x3f] %v1196_v1  ;;  %v1340_v10 = vld [vmem:[%s1525_s1] sm:$0xff]  ;;  %s1199_s7 = smov 98   ;;  %s1200_s8 = smov 122   ;;  %vm210_vm1 = vcmask 275456  }
  0x2a   : > { %v190_v2 = vand.u32 127, %v189_v0  ;;  %209 = vst [vmem:[#allocation2 + $0x8] sm:$0x3f] %v1196_v1  ;;  %420 = vrot.lane.b32.xlu2 %v1340_v10, %s1197_s5  ;;  %s1201_s9 = smov 110   ;;  %s1202_s10 = smov 104   ;;  %vm226_vm2 = vcmask 1043592  }
  0x2b   : > { %214 = vst [vmem:[#allocation1] ss:$2 sm:$0xff] %v212_v9  ;;  %s1203_s11 = smov 92   ;;  %s1204_s17 = smov 86   ;;  %vm1353_vm3 = vcmp.ge.s32.totalorder %v189_v0, 17  ;;  %vm1357_vm4 = vcmp.lt.s32.totalorder %v189_v0, 273 }
  0x2c   : > { %v191_v3 = vadd.s32 128, %v190_v2  ;;  %v1328_v4 = vshra.s32 %v190_v2, 4  ;;  %v1333_v7 = vand.u32 15, %v190_v2  ;;  %211 = vst.msk [vmem:[#allocation2 + $0x10] sm:$0x3f] %vm210_vm1, %v1196_v1  ;;  %vm221_vm5 = vcmask 138240   ;;  %vm244_vm6 = vmand %vm1353_vm3, %vm1357_vm4 }
  0x2d   : > { %vm229_vm7 = vcmask 134144   ;;  %vm306_vm14 = vcmask 1045504   ;;  %s1205_s19 = smov 126   ;;  %s1206_s20 = smov 127   ;;  %vm303_vm15 = vcmask 48128   ;;  %vm413_vm3 = vcmask 1031168  }
  0x2e   : > { %v1330_v5 = vshra.s32 %v191_v3, 4  ;;  %v196_v6 = vcvt.s32.f32 %v1328_v4  ;;  %v1335_v8 = vand.u32 15, %v191_v3  ;;  %v202_v15 = vcvt.s32.f32 %v1333_v7  ;;  %s1207_s22 = smov 112   ;;  %s1208_s27 = smov 111  }
  0x2f   : > { %vm260_vm8 = vcmp.ge.s32.totalorder %v1328_v4, 1  ;;  %vm264_vm9 = vcmp.ge.s32.totalorder %v1333_v7, 1  ;;  %s1209_s28 = smov 96   ;;  %s1210_s29 = smov 95   ;;  %vm266_vm1 = vcmp.lt.s32.totalorder %v1333_v7, 15 }
  0x30   : > { %v197_v11 = vcvt.s32.f32 %v1330_v5  ;;  %v198_v12 = vmul.f32 0.13333334, %v196_v6  ;;  %v203_v13 = vcvt.s32.f32 %v1335_v8  ;;  %v204_v20 = vmul.f32 0.13333334, %v202_v15  ;;  %vm271_vm12 = vmand %vm260_vm8, %vm264_vm9  ;;  %s1211_s30 = smov 94   ;;  %s1212_s4 = smov 80  }
  0x31   : > { %vm261_vm10 = vcmp.ge.s32.totalorder %v1330_v5, 1  ;;  %vm265_vm11 = vcmp.ge.s32.totalorder %v1335_v8, 1  ;;  %vm401_vm4 = vmand %vm260_vm8, %vm266_vm1 }
  0x32   : > { %v199_v14 = vmul.f32 0.13333334, %v197_v11  ;;  %v205_v16 = vmul.f32 0.13333334, %v203_v13  ;;  %v986_v17 = vadd.f32 -1.0, %v198_v12  ;;  %617 = vrot.lane.b32.xlu2 %v1340_v10, %s1199_s7  ;;  %v988_v24 = vadd.f32 -1.0, %v204_v20  ;;  %vm272_vm13 = vmand %vm261_vm10, %vm265_vm11 }
  0x33   : > { %v215_v22 = vld.sshfl [vmem:[#allocation1] sm:$0xff pattern:$0x75316420]  ;;  %v216_v26 = vld.sshfl [vmem:[#allocation1 + $0x8] sm:$0xff pattern:$0x75316420] }
  0x34   : > { %v987_v18 = vadd.f32 -1.0, %v199_v14  ;;  %v989_v21 = vadd.f32 -1.0, %v205_v16  ;;  %217 = vrot.lane.b32.xlu1 %v215_v22, %s1198_s6  ;;  %v880_v22 = vld [vmem:[%s1526_s2] sm:$0xff]  ;;  %s1032_s7 = sshll.u32 %s1255_s16, 4 }
  0x36   : > { %v233_v19 = vrot.slane %v987_v18, 7  ;;  %v250_v25 = vrot.slane %v989_v21, 7 }
  0x38   : > { %v235_v23 = vsel %vm234_vm0, %v986_v17, %v233_v19  ;;  %v251_v27 = vsel %vm234_vm0, %v988_v24, %v250_v25  ;;  %vm293_vm0 = vcmask 1039360   ;;  %v1213_v24 = vmov 0  }
  0x39   : > { %236 = vrot.lane.b32.xlu0 %v235_v23, %s1198_s6 }
  0x3a   : > { %1097 = vset.pattern.permute.xlu0 %v1213_v24 }
  0x3c   : > { %219 = vrot.lane.b32.xlu1 %v216_v26, %s1198_s6 }
  0x41   : > { %252 = vrot.lane.b32.xlu0 %v251_v27, %s1198_s6  ;;  %s985_s6 = sshll.u32 %s1320_s26, 4 }
  0x44   : > { %301 = vrot.lane.b32.xlu1 %v1340_v10, %s1200_s8 }
  0x49   : > { %489 = vrot.lane.b32.xlu0 %v1340_v10, %s1201_s9 }
  0x4c   : > { %541 = vrot.lane.b32.xlu1 %v1340_v10, %s1202_s10  ;;  %s902_s10 = scalar_lea.hbm %s1527_s3, %s1032_s7 }
  0x4d   : > { %s906_s16 = sshll.u32 %s902_s10, 4  ;;  %s907_s16 = int_to_ptr.hbm [resolvable:$true] %s906_s16 }
  0x51   : > { %688 = vrot.lane.b32.xlu0 %v1340_v10, %s1203_s11  ;;  %s188_s11 = scalar_lea.vmem [#allocation6], %s985_s6 }
  0x54   : > { %757 = vrot.lane.b32.xlu1 %v1340_v10, %s1204_s17  ;;  %s904_s17 = sshll.u32 %s188_s11, 4  ;;  %s905_s17 = int_to_ptr.vmem [resolvable:$true] %s904_s17 }
  0x84   : > { %v421_v44 = vpop.permute.xlu2 %420 }
  0x8c   : > { %v1387_v45 = vpop.permute.xlu2 %617 }
  0xa6   : > { %v218_v30 = vpop.permute.xlu1 %217 }
  0xa7   : > { %227 = vst.msk [vmem:[#allocation2] sm:$0xf] %vm226_vm2, %v218_v30  ;;  %vm267_vm2 = vcmp.lt.s32.totalorder %v1335_v8, 15 }
  0xab   : > { %v237_v31 = vpop.permute.xlu0 %236 }
  0xac   : > { %v238_v32 = vrot.slane %v237_v31, 7 }
  0xae   : > { %v239_v33 = vsel %vm221_vm5, %v238_v32, %v237_v31  ;;  %v220_v34 = vpop.permute.xlu1 %219 }
  0xaf   : > { %246 = vst.msk [vmem:[#allocation2 + $0x4] ss:$8 sm:$0x7] %vm244_vm6, %v239_v33  ;;  %v222_v35 = vsel %vm221_vm5, %v218_v30, %v220_v34 }
  0xb0   : > { %230 = vst.msk [vmem:[#allocation2 + $0x10] sm:$0xf] %vm229_vm7, %v220_v34  ;;  %vm610_vm7 = vcmask 900096  }
  0xb1   : > { %228 = vst [vmem:[#allocation2 + $0x8] sm:$0xf] %v222_v35 }
  0xb3   : > { %v253_v36 = vpop.permute.xlu0 %252 }
  0xb4   : > { %v254_v37 = vrot.slane %v253_v36, 7 }
  0xb6   : > { %v255_v38 = vsel %vm221_vm5, %v254_v37, %v253_v36  ;;  %v302_v46 = vpop.permute.xlu1 %301  ;;  %vm402_vm5 = vmand %vm261_vm10, %vm267_vm2 }
  0xb7   : > { %258 = vst.msk [vmem:[#allocation2 + $0x5] ss:$8 sm:$0x7] %vm244_vm6, %v255_v38  ;;  %vm482_vm6 = vcmask 916480  }
  0xbb   : > { %v490_v48 = vpop.permute.xlu0 %489 }
  0xbe   : > { %v279_v39 = vld [vmem:[#allocation2 + $0x10] sm:$0x3f]  ;;  %v269_v40 = vld [vmem:[#allocation2] sm:$0x3f]  ;;  %v270_v41 = vld [vmem:[#allocation2 + $0x8] sm:$0x3f]  ;;  %v1389_v49 = vpop.permute.xlu1 %541 }
  0xbf   : > { %411 = vrot.lane.b32.xlu1 %v279_v39, %s1205_s19  ;;  %291 = vrot.lane.b32.xlu0 %v279_v39, %s1206_s20  ;;  %v277_v42 = vsel %vm271_vm12, %v269_v40, 0.0  ;;  %v278_v43 = vsel %vm272_vm13, %v270_v41, 0.0  ;;  %vm681_vm12 = vcmask 785408  }
  0xc0   : > { %287 = vrot.lane.b32.xlu2 %v269_v40, %s1206_s20  ;;  %994 = vmatpush.msk.msra.mxu2 %vm306_vm14, %v277_v42 }
  0xc1   : > { %996 = vmatpush.msk.msra.mxu3 %vm306_vm14, %v278_v43  ;;  %995 = vmatmul.msk.f32.vlgmr.msra.gmra.mxu2 %vm303_vm15, %v1340_v10 }
  0xc2   : > { %997 = vmatmul.msk.f32.vlgmr.msra.gmra.mxu3 %vm303_vm15, %v1340_v10 }
  0xc3   : > { %v1395_v53 = vpop.permute.xlu0 %688 }
  0xc6   : > { %v1397_v54 = vpop.permute.xlu1 %757 }
  0xc7   : > { %480 = vrot.lane.b32.xlu1 %v279_v39, %s1207_s22  ;;  %409 = vrot.lane.b32.xlu0 %v270_v41, %s1205_s19 }
  0xc8   : > { %289 = vrot.lane.b32.xlu2 %v270_v41, %s1206_s20  ;;  %s1142_s20 = sshra.s32 %s907_s16, 4  ;;  %s1143_s20 = int_to_ptr.hbm [resolvable:$true] %s1142_s20 }
  0xc9   : > { %p1149_p0 = scmp.lt.s32.totalorder %s1143_s20, %s1527_s3 }
  0xcf   : > { %478 = vrot.lane.b32.xlu0 %v270_v41, %s1207_s22  ;;  %604 = vrot.lane.b32.xlu1 %v269_v40, %s1201_s9 }
  0xd0   : > { %407 = vrot.lane.b32.xlu2 %v269_v40, %s1205_s19  ;;  %s891_s19 = scalar_lea.sflag [#allocation5], %s1320_s26 }
  0xd7   : > { %608 = vrot.lane.b32.xlu0 %v279_v39, %s1201_s9  ;;  %543 = vrot.lane.b32.xlu1 %v269_v40, %s1208_s27 }
  0xd8   : > { %476 = vrot.lane.b32.xlu2 %v269_v40, %s1207_s22  ;;  %s1144_s22 = scalar_lea.hbm %s1143_s20, 16 }
  0xd9   : > { %p1145_p6 = scmp.ne.s32.totalorder %s1143_s20, %s1144_s22 }
  0xdb   : > { %p1146_p9 = pnand %p1145_p6, %p1284_p11 }
  0xdd   : > { %p1147_p13 = pneg %p1146_p9 }
  0xdf   : > { %547 = vrot.lane.b32.xlu0 %v279_v39, %s1208_s27  ;;  %677 = vrot.lane.b32.xlu1 %v270_v41, %s1209_s28 }
  0xe0   : > { %606 = vrot.lane.b32.xlu2 %v270_v41, %s1201_s9 }
  0xe7   : > { %675 = vrot.lane.b32.xlu0 %v269_v40, %s1209_s28  ;;  %746 = vrot.lane.b32.xlu1 %v270_v41, %s1210_s29 }
  0xe8   : > { %545 = vrot.lane.b32.xlu2 %v270_v41, %s1208_s27 }
  0xef   : > { %744 = vrot.lane.b32.xlu0 %v269_v40, %s1210_s29  ;;  %819 = vrot.lane.b32.xlu1 %v279_v39, %s1211_s30 }
  0xf0   : > { %679 = vrot.lane.b32.xlu2 %v279_v39, %s1209_s28 }
  0xf7   : > { %817 = vrot.lane.b32.xlu0 %v270_v41, %s1211_s30 }
  0xf8   : > { %748 = vrot.lane.b32.xlu2 %v279_v39, %s1210_s29  ;;  %s1148_s29 = scalar_lea.hbm %s1527_s3, 32 }
  0xf9   : > { %p1150_p1 = scmp.lt.s32.totalorder %s1148_s29, %s1144_s22 }
  0xfb   : > { %p1151_p3 = por %p1150_p1, %p1149_p0 }
  0xfd   : > { %p1152_p4 = pnand %p1151_p3, %p1147_p13 }
  0xff   : > { %883 = vperm.xlu0 %1097, %v880_v22  }
 0x100   : > { %815 = vrot.lane.b32.xlu2 %v269_v40, %s1211_s30 }
 0x108   : > { %828 = vrot.lane.b32.xlu2 %v1340_v10, %s1212_s4 }
 0x11a   : > { %v288_v47 = vpop.permute.xlu2 %287 }
 0x122   : > { %v290_v50 = vpop.permute.xlu2 %289 }
 0x123   : > { %v294_v51 = vsel %vm293_vm0, %v288_v47, %v290_v50 }
 0x124   : > { %v298_v52 = vsel %vm260_vm8, %v294_v51, 0.0  ;;  %vm549_vm8 = vcmask 908288  }
 0x125   : > { %990 = vmatpush.msk.msra.mxu0 %vm306_vm14, %v298_v52 }
 0x126   : > { %991 = vmatmul.msk.f32.vlgmr.msra.gmra.mxu0 %vm303_vm15, %v302_v46 }
 0x12a   : > { %v408_v55 = vpop.permute.xlu2 %407 }
 0x131   : > { %v412_v56 = vpop.permute.xlu1 %411  ;;  %v292_v57 = vpop.permute.xlu0 %291 }
 0x132   : > { %v477_v58 = vpop.permute.xlu2 %476  ;;  %v295_v59 = vsel %vm293_vm0, %v290_v50, %v292_v57  ;;  %vm262_vm0 = vcmp.lt.s32.totalorder %v1328_v4, 15 }
 0x133   : > { %v299_v60 = vsel %vm261_vm10, %v295_v59, 0.0  ;;  %vm263_vm10 = vcmp.lt.s32.totalorder %v1330_v5, 15 }
 0x134   : > { %992 = vmatpush.msk.msra.mxu1 %vm306_vm14, %v299_v60  ;;  %vm670_vm13 = vmand %vm263_vm10, %vm265_vm11 }
 0x135   : > { %993 = vmatmul.msk.f32.vlgmr.msra.gmra.mxu1 %vm303_vm15, %v302_v46 }
 0x139   : > { %v481_v61 = vpop.permute.xlu1 %480  ;;  %v410_v62 = vpop.permute.xlu0 %409 }
 0x13a   : > { %v414_v63 = vsel %vm413_vm3, %v408_v55, %v410_v62  ;;  %v415_v0 = vsel %vm413_vm3, %v410_v62, %v412_v56  ;;  %v607_v1 = vpop.permute.xlu2 %606  ;;  %vm750_vm3 = vcmask 777216  }
 0x13b   : > { %v418_v2 = vsel %vm401_vm4, %v414_v63, 0.0  ;;  %v419_v3 = vsel %vm402_vm5, %v415_v0, 0.0  ;;  %vm821_vm4 = vcmask 769024   ;;  %vm810_vm5 = vmand %vm263_vm10, %vm267_vm2 }
 0x13c   : > { %998 = vmatpush.msk.msrb.mxu0 %vm306_vm14, %v418_v2  ;;  %1000 = vmatpush.msk.msrb.mxu1 %vm306_vm14, %v419_v3 }
 0x13d   : > { %999 = vmatmul.msk.f32.vlgmr.msrb.gmra.mxu0 %vm303_vm15, %v421_v44  ;;  %1001 = vmatmul.msk.f32.vlgmr.msrb.gmra.mxu1 %vm303_vm15, %v421_v44 }
 0x141   : > { %v479_v6 = vpop.permute.xlu0 %478  ;;  %v605_v9 = vpop.permute.xlu1 %604 }
 0x142   : > { %v483_v10 = vsel %vm482_vm6, %v477_v58, %v479_v6  ;;  %v484_v11 = vsel %vm482_vm6, %v479_v6, %v481_v61  ;;  %v611_v12 = vsel %vm610_vm7, %v605_v9, %v607_v1  ;;  %v546_v16 = vpop.permute.xlu2 %545 }
 0x143   : > { %v615_v13 = vsel %vm266_vm1, %v611_v12, 0.0  ;;  %v487_v14 = vsel %vm264_vm9, %v483_v10, 0.0  ;;  %v488_v15 = vsel %vm265_vm11, %v484_v11, 0.0  ;;  %vm669_vm11 = vmand %vm262_vm0, %vm264_vm9 }
 0x144   : > { %1002 = vmatpush.msk.msrb.mxu2 %vm306_vm14, %v487_v14  ;;  %1004 = vmatpush.msk.msrb.mxu3 %vm306_vm14, %v488_v15  ;;  %vm809_vm9 = vmand %vm262_vm0, %vm266_vm1  ;;  %v378_v5 = vpop.f32.mrf.mxu2 }
 0x145   : > { %1003 = vmatmul.msk.f32.vlgmr.msrb.gmra.mxu2 %vm303_vm15, %v490_v48  ;;  %1005 = vmatmul.msk.f32.vlgmr.msrb.gmra.mxu3 %vm303_vm15, %v490_v48  ;;  %v398_v8 = vpop.f32.mrf.mxu3 }
 0x146   : > { %1010 = vmatpush.msk.msra.mxu2 %vm306_vm14, %v615_v13 }
 0x149   : > { %v609_v17 = vpop.permute.xlu0 %608  ;;  %v544_v18 = vpop.permute.xlu1 %543 }
 0x14a   : > { %v612_v19 = vsel %vm610_vm7, %v607_v1, %v609_v17  ;;  %v550_v20 = vsel %vm549_vm8, %v544_v18, %v546_v16  ;;  %v680_v23 = vpop.permute.xlu2 %679 }
 0x14b   : > { %v616_v21 = vsel %vm267_vm2, %v612_v19, 0.0  ;;  %1006 = vmatpush.msk.msra.mxu0 %vm306_vm14, %v550_v20 }
 0x14c   : > { %1007 = vmatmul.msk.f32.vlgmr.msra.gmra.mxu0 %vm303_vm15, %v1389_v49  ;;  %1012 = vmatpush.msk.msra.mxu3 %vm306_vm14, %v616_v21 }
 0x14d   : > { %1011 = vmatmul.msk.f32.vlgmr.msra.gmra.mxu2 %vm303_vm15, %v1387_v45  ;;  %1013 = vmatmul.msk.f32.vlgmr.msra.gmra.mxu3 %vm303_vm15, %v1387_v45 }
 0x151   : > { %v548_v25 = vpop.permute.xlu0 %547  ;;  %v678_v26 = vpop.permute.xlu1 %677 }
 0x152   : > { %v551_v27 = vsel %vm549_vm8, %v546_v16, %v548_v25  ;;  %v683_v28 = vsel %vm681_vm12, %v678_v26, %v680_v23  ;;  %v749_v30 = vpop.permute.xlu2 %748 }
 0x153   : > { %v687_v29 = vsel %vm670_vm13, %v683_v28, 0.0  ;;  %1008 = vmatpush.msk.msra.mxu1 %vm306_vm14, %v551_v27 }
 0x154   : > { %1009 = vmatmul.msk.f32.vlgmr.msra.gmra.mxu1 %vm303_vm15, %v1389_v49 }
 0x155   : > { %1016 = vmatpush.msk.msrb.mxu1 %vm306_vm14, %v687_v29 }
 0x159   : > { %v676_v31 = vpop.permute.xlu0 %675  ;;  %v747_v32 = vpop.permute.xlu1 %746 }
 0x15a   : > { %v682_v33 = vsel %vm681_vm12, %v676_v31, %v678_v26  ;;  %v752_v34 = vsel %vm750_vm3, %v747_v32, %v749_v30  ;;  %v816_v38 = vpop.permute.xlu2 %815 }
 0x15b   : > { %v686_v35 = vsel %vm669_vm11, %v682_v33, 0.0  ;;  %v756_v36 = vsel %vm263_vm10, %v752_v34, 0.0 }
 0x15c   : > { %1014 = vmatpush.msk.msrb.mxu0 %vm306_vm14, %v686_v35  ;;  %1017 = vmatmul.msk.f32.vlgmr.msrb.gmra.mxu1 %vm303_vm15, %v1395_v53 }
 0x15d   : > { %1020 = vmatpush.msk.msrb.mxu3 %vm306_vm14, %v756_v36  ;;  %1015 = vmatmul.msk.f32.vlgmr.msrb.gmra.mxu0 %vm303_vm15, %v1395_v53 }
 0x15e   : > { %1021 = vmatmul.msk.f32.vlgmr.msrb.gmra.mxu3 %vm303_vm15, %v1397_v54 }
 0x161   : > { %v745_v37 = vpop.permute.xlu0 %744  ;;  %v820_v41 = vpop.permute.xlu1 %819 }
 0x162   : > { %v751_v39 = vsel %vm750_vm3, %v745_v37, %v747_v32  ;;  %v829_v45 = vpop.permute.xlu2 %828 }
 0x163   : > { %v755_v40 = vsel %vm262_vm0, %v751_v39, 0.0 }
 0x164   : > { %1018 = vmatpush.msk.msrb.mxu2 %vm306_vm14, %v755_v40 }
 0x165   : > { %1019 = vmatmul.msk.f32.vlgmr.msrb.gmra.mxu2 %vm303_vm15, %v1397_v54 }
 0x169   : > { %v818_v42 = vpop.permute.xlu0 %817 }
 0x16a   : > { %v822_v43 = vsel %vm821_vm4, %v816_v38, %v818_v42  ;;  %v823_v44 = vsel %vm821_vm4, %v818_v42, %v820_v41 }
 0x16b   : > { %v826_v46 = vsel %vm809_vm9, %v822_v43, 0.0  ;;  %v827_v47 = vsel %vm810_vm5, %v823_v44, 0.0 }
 0x16c   : > { %1022 = vmatpush.msk.msra.mxu0 %vm306_vm14, %v826_v46  ;;  %1024 = vmatpush.msk.msra.mxu1 %vm306_vm14, %v827_v47 }
 0x16d   : > { %1023 = vmatmul.msk.f32.vlgmr.msra.gmra.mxu0 %vm303_vm15, %v829_v45  ;;  %1025 = vmatmul.msk.f32.vlgmr.msra.gmra.mxu1 %vm303_vm15, %v829_v45 }
 0x171   : > { %v884_v14 = vpop.permute.xlu0 %883 }
 0x1a3   : > { %v330_v7 = vpop.f32.mrf.mxu0 }
 0x1a4   : > { %v379_v54 = vadd.f32 %v378_v5, %v330_v7 }
 0x1b2   : > { %v350_v4 = vpop.f32.mrf.mxu1 }
 0x1b3   : > { %v399_v55 = vadd.f32 %v398_v8, %v350_v4 }
 0x1ba   : > { %v467_v48 = vpop.f32.mrf.mxu1  ;;  %v447_v49 = vpop.f32.mrf.mxu0 }
 0x1bb   : > { %v470_v56 = vadd.f32 %v447_v49, %v379_v54  ;;  %v471_v57 = vadd.f32 %v467_v48, %v399_v55 }
 0x1c8   : > { %v536_v50 = vpop.f32.mrf.mxu3  ;;  %v516_v51 = vpop.f32.mrf.mxu2 }
 0x1c9   : > { %v575_v53 = vpop.f32.mrf.mxu0  ;;  %v539_v59 = vadd.f32 %v516_v51, %v470_v56  ;;  %v540_v60 = vadd.f32 %v536_v50, %v471_v57 }
 0x1cb   : > { %v598_v1 = vadd.f32 %v575_v53, %v539_v59 }
 0x1d0   : > { %v664_v58 = vpop.f32.mrf.mxu3  ;;  %v644_v61 = vpop.f32.mrf.mxu2 }
 0x1d1   : > { %v595_v52 = vpop.f32.mrf.mxu1  ;;  %v667_v2 = vadd.f32 %v644_v61, %v598_v1 }
 0x1d2   : > { %v599_v62 = vadd.f32 %v595_v52, %v540_v60 }
 0x1d4   : > { %v668_v3 = vadd.f32 %v664_v58, %v599_v62 }
 0x1d9   : > { %v735_v63 = vpop.f32.mrf.mxu1 }
 0x1da   : > { %v715_v0 = vpop.f32.mrf.mxu0  ;;  %v739_v9 = vadd.f32 %v735_v63, %v668_v3 }
 0x1db   : > { %v738_v10 = vadd.f32 %v715_v0, %v667_v2 }
 0x1e1   : > { %v804_v6 = vpop.f32.mrf.mxu3 }
 0x1e2   : > { %v808_v12 = vadd.f32 %v804_v6, %v739_v9 }
 0x1e8   : > { %v784_v11 = vpop.f32.mrf.mxu2 }
 0x1e9   : > { %v807_v13 = vadd.f32 %v784_v11, %v738_v10 }
 0x1ea   : > { %v855_v15 = vpop.f32.mrf.mxu0  ;;  %v875_v16 = vpop.f32.mrf.mxu1 }
 0x1eb   : > { %v878_v17 = vadd.f32 %v855_v15, %v807_v13  ;;  %v879_v18 = vadd.f32 %v875_v16, %v808_v12 }
 0x1ed   : > { %v886_v19 = vadd.f32 %v884_v14, %v878_v17  ;;  %v887_v20 = vadd.f32 %v884_v14, %v879_v18 }
 0x1ef   : > { %888 = vst [vmem:[%s188_s11] sm:$0xff] %v886_v19 }
 0x1f0   : > { %889 = vst [vmem:[%s188_s11 + $0x8] sm:$0xff] %v887_v20 }
 0x1f1   : > { %1155 = shalt.err (!%p1152_p4)
}
 0x1f2   : > { %1035 = dma.vmem_to_hbm [thread:$0]  (%p1284_p11), %s905_s17, 256, %s907_s16, %s891_s19  }
 0x1f3 PF: > { %s918_s26 = sand.u32 1, %s1182_s12   ;;  %p1537_p7 = scmp.ge.s32.totalorder %s1194_s15, 2 }
 0x1f4   : > { %s919_s23 = scalar_lea.sflag [#allocation5], %s918_s26 }
 0x1f5   : > { %p1042_p5 = pnand %p1537_p7, %p1288_p12 }
 0x1f7   : > { %p1043_p8 = pneg %p1042_p5 }
 0x1f9   : > { %1177 = dma.done.wait (%p1043_p8), %s919_s23, 256  }
 0x1fa   : > { %1179 = vsyncadd (%p1043_p8), %s919_s23, 4294967040  ;;  %p16_p10 = scmp.ge.s32.totalorder %s1259_s18, 4   ;;  %s1538_s12 = smov %s1186_s13 }
 0x1fb   : > { %s1539_s13 = smov %s1190_s14  ;;  %s1540_s14 = smov %s1271_s21 }
 0x1fc   : > { %s1541_s15 = smov %s1259_s18  ;;  %18 = sbr.rel (!%p16_p10) target bundleno = 5 (0x5), region = 79 }
 0x201   :  { %925 = vsyncpa [#allocation4], 1 }
 0x202   :  { %927 = vsyncpa [#allocation4 + $0x1], 1 }
 0x203   :  { %928 = vsyncpa [#allocation5], 1 }
 0x204   :  { %930 = vsyncpa [#allocation5 + $0x1], 1 }

</bundles_post_ra>
